<compile_context>
chip_gen: v5e
topology: v5e:2x2
jax: 0.10.0
libtpu: 0.0.40
codegen_flags: <defaults>
</compile_context>

<pallas_src>
import math

import jax
import jax.numpy as jnp
from jax import lax
from jax.experimental import pallas as pl
from jax.experimental.pallas import tpu as pltpu

_BF16 = jnp.bfloat16


def _layer_norm(v, g, b, eps=1e-5):
    # Two-pass (x - mu)^2 variance: avoids E[x^2]-E[x]^2 cancellation.
    mu = jnp.mean(v, axis=-1, keepdims=True)
    c = v - mu
    var = jnp.mean(c * c, axis=-1, keepdims=True)
    return c * lax.rsqrt(var + eps) * g + b


# ---------------------------------------------------------------------------
# Kernel A: LN1 + K/V projection, streamed over (batch, kv-tile).
# Writes K/V head-leading (B, n_head, T, hd) so kernel B indexes whole heads.
# ---------------------------------------------------------------------------
def _kv_project_kernel(x_ref, g1_ref, b1_ref, wk_ref, bk_ref, wv_ref, bv_ref,
                       k_ref, v_ref):
    n_head, _, hd = k_ref.shape
    x1 = _layer_norm(x_ref[...].astype(jnp.float32), g1_ref[...], b1_ref[...])
    x1b = x1.astype(_BF16)
    k = jnp.dot(x1b, wk_ref[...], preferred_element_type=jnp.float32) + bk_ref[...]
    v = jnp.dot(x1b, wv_ref[...], preferred_element_type=jnp.float32) + bv_ref[...]
    kb = k.astype(_BF16)
    vb = v.astype(_BF16)
    for h in range(n_head):          # static: heads scattered once per KV tile
        lo = h * hd
        k_ref[h] = kb[:, lo:lo + hd]
        v_ref[h] = vb[:, lo:lo + hd]


# ---------------------------------------------------------------------------
# Kernel B: per query tile -> LN1 (recomputed), attention, LN2, MLP.
# ---------------------------------------------------------------------------
def _attn_mlp_kernel(x_ref, g1_ref, b1_ref, wq_ref, bq_ref, k_ref, v_ref,
                     wo_ref, bo_ref, g2_ref, b2_ref,
                     wfc_ref, bfc_ref, wpr_ref, bpr_ref, o_ref):
    tq, C = x_ref.shape
    n_head = k_ref.shape[0]

    x1 = _layer_norm(x_ref[...].astype(jnp.float32), g1_ref[...], b1_ref[...])
    x1b = x1.astype(_BF16)

    def head_body(h, acc):
        # Q projection for this head (softmax scale pre-folded into Wq/bq).
        qh = jnp.dot(x1b, wq_ref[h], preferred_element_type=jnp.float32)
        qh = (qh + bq_ref[h]).astype(_BF16)                        # (tq, hd)
        kh = k_ref[h]                                              # (T, hd)
        vh = v_ref[h]                                              # (T, hd)
        s = lax.dot_general(qh, kh, (((1,), (1,)), ((), ())),
                            preferred_element_type=jnp.float32)    # (tq, T)
        s = s - jnp.max(s, axis=-1, keepdims=True)
        p = jnp.exp(s)
        p = p * pl.reciprocal(jnp.sum(p, axis=-1, keepdims=True), approx=True)
        yh = jnp.dot(p.astype(_BF16), vh,
                     preferred_element_type=jnp.float32)            # (tq, hd)
        # Fold this head straight into the output projection (no concat,
        # no lane-dim stores): y @ Wo == sum_h y_h @ Wo[h].
        return acc + jnp.dot(yh.astype(_BF16), wo_ref[h],
                             preferred_element_type=jnp.float32)    # (tq, C)

    att0 = jnp.zeros((tq, C), jnp.float32)
    if n_head <= 8:                      # small head count: static unroll
        att = att0
        for h in range(n_head):
            att = head_body(h, att)
    else:                                # large head count: keep one body
        att = lax.fori_loop(0, n_head, head_body, att0)
    att = att + bo_ref[...]

    x2 = x1 + att                        # residual on ln_1(x), per module

    x2n = _layer_norm(x2, g2_ref[...], b2_ref[...])
    hid = jnp.dot(x2n.astype(_BF16), wfc_ref[...],
                  preferred_element_type=jnp.float32) + bfc_ref[...]
    hid = jnp.maximum(hid, 0.0)          # ReLU
    m = jnp.dot(hid.astype(_BF16), wpr_ref[...],
                preferred_element_type=jnp.float32) + bpr_ref[...]

    o_ref[...] = (x2 + m).astype(o_ref.dtype)


def _pick_tile(T, target=256):
    """Largest tile size <= target that divides T (multiple of 8 if tiled)."""
    if T <= target:
        return T
    for cand in range(min(target, T), 7, -8):
        if T % cand == 0:
            return cand
    return T


def encoder_layer(x, params, n_head, tq=None, tkv=None):
    """x: (B, T, C) float32. params: dict of f32 weights (see init_params)."""
    B, T, C = x.shape
    assert C % n_head == 0
    hd = C // n_head
    H = 4 * C
    if tq is None:
        tq = _pick_tile(T)
    if tkv is None:
        tkv = _pick_tile(T)
    assert T % tq == 0 and T % tkv == 0

    # Host-side weight prep: bf16 casts, softmax scale folded into Wq/bq,
    # per-head layouts so the kernels never slice the lane dimension.
    scale = 1.0 / math.sqrt(hd)
    wq_h = (params["wq"] * scale).reshape(C, n_head, hd).transpose(1, 0, 2)
    wq_h = wq_h.astype(_BF16)                                   # (nh, C, hd)
    bq_h = (params["bq"].reshape(n_head, 1, hd) * scale).astype(jnp.float32)
    wo_h = params["wo"].reshape(n_head, hd, C).astype(_BF16)    # (nh, hd, C)
    wk = params["wk"].astype(_BF16)
    wv = params["wv"].astype(_BF16)
    wfc = params["wfc"].astype(_BF16)
    wpr = params["wproj"].astype(_BF16)

    # VMEM budget: working-set estimate + headroom, clamped to physical.
    try:
        phys = pltpu.get_tpu_info().vmem_capacity_bytes
    except Exception:
        phys = 64 * 1024 * 1024
    f32, bf = 4, 2
    kv_bytes = 2 * 2 * n_head * T * hd * bf            # K + V, double-buffered
    w_bytes = (2 * C * C + C * H + H * C) * bf          # wq+wo, wfc, wproj
    b_bytes = (n_head * hd + 8 * C + H) * f32
    io_bytes = 2 * 2 * tq * C * f32                     # x + out, double-buffered
    transient = (tq * T + tq * H + 6 * tq * C) * f32
    need = kv_bytes + 2 * w_bytes + b_bytes + io_bytes + transient
    vmem_limit = int(min(0.9 * phys, max(32 * 1024 * 1024, 1.25 * need)))

    cparams = pltpu.CompilerParams(
        dimension_semantics=("parallel", "parallel"),
        vmem_limit_bytes=vmem_limit)

    def wspec(shape, buffered):
        # Constant-index weight block; single-buffer when supported.
        zmap = lambda b, t: (0,) * len(shape)
        if buffered and hasattr(pl, "Buffered"):
            return pl.BlockSpec(shape, zmap, pipeline_mode=pl.Buffered(1))
        return pl.BlockSpec(shape, zmap)

    def run(buffered):
        ws = lambda shape: wspec(shape, buffered)

        # ---- Kernel A: LN1 + K/V projection (head-leading output) ----
        k_arr, v_arr = pl.pallas_call(
            _kv_project_kernel,
            out_shape=(jax.ShapeDtypeStruct((B, n_head, T, hd), _BF16),
                       jax.ShapeDtypeStruct((B, n_head, T, hd), _BF16)),
            grid=(B, T // tkv),
            in_specs=[
                pl.BlockSpec((None, tkv, C), lambda b, t: (b, t, 0)),   # x
                ws((1, C)), ws((1, C)),                                 # ln1
                ws((C, C)), ws((1, C)),                                 # Wk, bk
                ws((C, C)), ws((1, C)),                                 # Wv, bv
            ],
            out_specs=(
                pl.BlockSpec((None, n_head, tkv, hd), lambda b, t: (b, 0, t, 0)),
                pl.BlockSpec((None, n_head, tkv, hd), lambda b, t: (b, 0, t, 0)),
            ),
            compiler_params=cparams,
        )(x, params["ln1_g"], params["ln1_b"], wk, params["bk"], wv, params["bv"])

        # ---- Kernel B: attention + MLP per query tile ----
        return pl.pallas_call(
            _attn_mlp_kernel,
            out_shape=jax.ShapeDtypeStruct((B, T, C), x.dtype),
            grid=(B, T // tq),
            in_specs=[
                pl.BlockSpec((None, tq, C), lambda b, t: (b, t, 0)),    # x tile
                ws((1, C)), ws((1, C)),                                 # ln1
                ws((n_head, C, hd)), ws((n_head, 1, hd)),               # Wq, bq
                pl.BlockSpec((None, n_head, T, hd), lambda b, t: (b, 0, 0, 0)),  # K
                pl.BlockSpec((None, n_head, T, hd), lambda b, t: (b, 0, 0, 0)),  # V
                ws((n_head, hd, C)), ws((1, C)),                        # Wo, bo
                ws((1, C)), ws((1, C)),                                 # ln2
                ws((C, H)), ws((1, H)),                                 # Wfc, bfc
                ws((H, C)), ws((1, C)),                                 # Wproj, bproj
            ],
            out_specs=pl.BlockSpec((None, tq, C), lambda b, t: (b, t, 0)),
            compiler_params=cparams,
        )(x, params["ln1_g"], params["ln1_b"], wq_h, bq_h, k_arr, v_arr,
          wo_h, params["bo"], params["ln2_g"], params["ln2_b"],
          wfc, params["bfc"], wpr, params["bproj"])

    try:
        return run(True)
    except Exception:
        # Fallback if pipeline_mode=pl.Buffered(1) weight specs are rejected.
        return run(False)


def init_params(key, C):
    """Deterministic synthetic params. Linear weights stored (in, out)."""
    H = 4 * C
    keys = jax.random.split(key, 12)
    s = 0.02
    return {
        "ln1_g": jnp.ones((1, C), jnp.float32),
        "ln1_b": jnp.zeros((1, C), jnp.float32),
        "wq": s * jax.random.normal(keys[0], (C, C), jnp.float32),
        "bq": s * jax.random.normal(keys[1], (1, C), jnp.float32),
        "wk": s * jax.random.normal(keys[2], (C, C), jnp.float32),
        "bk": s * jax.random.normal(keys[3], (1, C), jnp.float32),
        "wv": s * jax.random.normal(keys[4], (C, C), jnp.float32),
        "bv": s * jax.random.normal(keys[5], (1, C), jnp.float32),
        "wo": s * jax.random.normal(keys[6], (C, C), jnp.float32),
        "bo": s * jax.random.normal(keys[7], (1, C), jnp.float32),
        "ln2_g": jnp.ones((1, C), jnp.float32),
        "ln2_b": jnp.zeros((1, C), jnp.float32),
        "wfc": s * jax.random.normal(keys[8], (C, H), jnp.float32),
        "bfc": s * jax.random.normal(keys[9], (1, H), jnp.float32),
        "wproj": s * jax.random.normal(keys[10], (H, C), jnp.float32),
        "bproj": s * jax.random.normal(keys[11], (1, C), jnp.float32),
    }


def _reference(x, p, n_head):
    """Plain-JAX f32 reference for sanity checking."""
    def ln(v, g, b):
        mu = jnp.mean(v, -1, keepdims=True)
        var = jnp.mean((v - mu) ** 2, -1, keepdims=True)
        return (v - mu) / jnp.sqrt(var + 1e-5) * g[0] + b[0]

    B, T, C = x.shape
    hd = C // n_head
    x1 = ln(x, p["ln1_g"], p["ln1_b"])
    q = x1 @ p["wq"] + p["bq"][0]
    k = x1 @ p["wk"] + p["bk"][0]
    v = x1 @ p["wv"] + p["bv"][0]
    q = q.reshape(B, T, n_head, hd).transpose(0, 2, 1, 3)
    k = k.reshape(B, T, n_head, hd).transpose(0, 2, 1, 3)
    v = v.reshape(B, T, n_head, hd).transpose(0, 2, 1, 3)
    att = jax.nn.softmax(q @ k.transpose(0, 1, 3, 2) / math.sqrt(hd), axis=-1)
    y = (att @ v).transpose(0, 2, 1, 3).reshape(B, T, C)
    y = y @ p["wo"] + p["bo"][0]
    x2 = x1 + y
    x2n = ln(x2, p["ln2_g"], p["ln2_b"])
    m = jnp.maximum(x2n @ p["wfc"] + p["bfc"][0], 0.0) @ p["wproj"] + p["bproj"][0]
    return x2 + m


if __name__ == "__main__":
    B, T, C, n_head = 2, 8, 32, 4
    key = jax.random.PRNGKey(0)
    k_x, k_p = jax.random.split(key)
    x = jax.random.normal(k_x, (B, T, C), jnp.float32)
    params = init_params(k_p, C)

    out = jax.block_until_ready(encoder_layer(x, params, n_head))

    ref = _reference(x, params, n_head)
    assert out.shape == (B, T, C)
    # bf16 matmul inputs (f32 accumulation) -> slightly looser tolerance.
    assert jnp.allclose(out, ref, atol=2e-2, rtol=2e-2), "mismatch vs reference"
    print("KERNEL_OK")
</pallas_src>

<mosaic_0001>
module attributes {stable_mosaic.version = 11 : i64} {
  func.func @_kv_project_kernel(%arg0: i32, %arg1: i32, %arg2: memref<1x8x32xf32, #tpu.memory_space<vmem>>, %arg3: memref<1x32xf32, #tpu.memory_space<vmem>>, %arg4: memref<1x32xf32, #tpu.memory_space<vmem>>, %arg5: memref<32x32xbf16, #tpu.memory_space<vmem>>, %arg6: memref<1x32xf32, #tpu.memory_space<vmem>>, %arg7: memref<32x32xbf16, #tpu.memory_space<vmem>>, %arg8: memref<1x32xf32, #tpu.memory_space<vmem>>, %arg9: memref<1x4x8x8xbf16, #tpu.memory_space<vmem>>, %arg10: memref<1x4x8x8xbf16, #tpu.memory_space<vmem>>) attributes {dimension_semantics = [#tpu.dimension_semantics<parallel>, #tpu.dimension_semantics<parallel>], iteration_bounds = array<i64: 2, 1>, scalar_prefetch = 0 : i64, scratch_operands = 0 : i64, tpu.core_type = #tpu.core_type<tc>, window_params = [{transform_indices = @transform_0, window_bounds = array<i64: 1, 8, 32>}, {pipeline_mode = #tpu.pipeline_mode<synchronous>, transform_indices = @transform_1, window_bounds = array<i64: 1, 32>}, {pipeline_mode = #tpu.pipeline_mode<synchronous>, transform_indices = @transform_2, window_bounds = array<i64: 1, 32>}, {pipeline_mode = #tpu.pipeline_mode<synchronous>, transform_indices = @transform_3, window_bounds = array<i64: 32, 32>}, {pipeline_mode = #tpu.pipeline_mode<synchronous>, transform_indices = @transform_4, window_bounds = array<i64: 1, 32>}, {pipeline_mode = #tpu.pipeline_mode<synchronous>, transform_indices = @transform_5, window_bounds = array<i64: 32, 32>}, {pipeline_mode = #tpu.pipeline_mode<synchronous>, transform_indices = @transform_6, window_bounds = array<i64: 1, 32>}, {transform_indices = @transform_7, window_bounds = array<i64: 1, 4, 8, 8>}, {transform_indices = @transform_8, window_bounds = array<i64: 1, 4, 8, 8>}]} {
    %c0 = arith.constant 0 : index
    %c0_0 = arith.constant 0 : index
    %c0_1 = arith.constant 0 : index
    %0 = vector.load %arg2[%c0, %c0_0, %c0_1] : memref<1x8x32xf32, #tpu.memory_space<vmem>>, vector<1x8x32xf32>
    %1 = vector.shape_cast %0 : vector<1x8x32xf32> to vector<8x32xf32>
    %c0_2 = arith.constant 0 : index
    %c0_3 = arith.constant 0 : index
    %2 = vector.load %arg3[%c0_2, %c0_3] : memref<1x32xf32, #tpu.memory_space<vmem>>, vector<1x32xf32>
    %c0_4 = arith.constant 0 : index
    %c0_5 = arith.constant 0 : index
    %3 = vector.load %arg4[%c0_4, %c0_5] : memref<1x32xf32, #tpu.memory_space<vmem>>, vector<1x32xf32>
    %cst = arith.constant dense<0.000000e+00> : vector<8xf32>
    %4 = vector.multi_reduction <add>, %1, %cst [1] : vector<8x32xf32> to vector<8xf32>
    %5 = vector.shape_cast %4 : vector<8xf32> to vector<8x1xf32>
    %cst_6 = arith.constant 3.200000e+01 : f32
    %6 = vector.broadcast %cst_6 : f32 to vector<8x1xf32>
    %7 = arith.divf %5, %6 : vector<8x1xf32>
    %8 = vector.broadcast %7 : vector<8x1xf32> to vector<8x32xf32>
    %9 = arith.subf %1, %8 : vector<8x32xf32>
    %10 = arith.mulf %9, %9 : vector<8x32xf32>
    %cst_7 = arith.constant dense<0.000000e+00> : vector<8xf32>
    %11 = vector.multi_reduction <add>, %10, %cst_7 [1] : vector<8x32xf32> to vector<8xf32>
    %12 = vector.shape_cast %11 : vector<8xf32> to vector<8x1xf32>
    %cst_8 = arith.constant 3.200000e+01 : f32
    %13 = vector.broadcast %cst_8 : f32 to vector<8x1xf32>
    %14 = arith.divf %12, %13 : vector<8x1xf32>
    %cst_9 = arith.constant 9.99999974E-6 : f32
    %15 = vector.broadcast %cst_9 : f32 to vector<8x1xf32>
    %16 = arith.addf %14, %15 : vector<8x1xf32>
    %17 = math.rsqrt %16 : vector<8x1xf32>
    %18 = vector.broadcast %17 : vector<8x1xf32> to vector<8x32xf32>
    %19 = arith.mulf %9, %18 : vector<8x32xf32>
    %20 = vector.broadcast %2 : vector<1x32xf32> to vector<8x32xf32>
    %21 = arith.mulf %19, %20 : vector<8x32xf32>
    %22 = vector.broadcast %3 : vector<1x32xf32> to vector<8x32xf32>
    %23 = arith.addf %21, %22 : vector<8x32xf32>
    %24 = arith.truncf %23 : vector<8x32xf32> to vector<8x32xbf16>
    %c0_10 = arith.constant 0 : index
    %c0_11 = arith.constant 0 : index
    %25 = vector.load %arg5[%c0_10, %c0_11] : memref<32x32xbf16, #tpu.memory_space<vmem>>, vector<32x32xbf16>
    %cst_12 = arith.constant dense<0.000000e+00> : vector<8x32xf32>
    %26 = tpu.matmul %24, %25, %cst_12 {dimension_numbers = #tpu.dot_dimension_numbers<[1], [0], [0], [1], [0, 0, 1, 1], [], []>} : vector<8x32xbf16>, vector<32x32xbf16>, vector<8x32xf32> -> vector<8x32xf32>
    %c0_13 = arith.constant 0 : index
    %c0_14 = arith.constant 0 : index
    %27 = vector.load %arg6[%c0_13, %c0_14] : memref<1x32xf32, #tpu.memory_space<vmem>>, vector<1x32xf32>
    %28 = vector.broadcast %27 : vector<1x32xf32> to vector<8x32xf32>
    %29 = arith.addf %26, %28 : vector<8x32xf32>
    %c0_15 = arith.constant 0 : index
    %c0_16 = arith.constant 0 : index
    %30 = vector.load %arg7[%c0_15, %c0_16] : memref<32x32xbf16, #tpu.memory_space<vmem>>, vector<32x32xbf16>
    %cst_17 = arith.constant dense<0.000000e+00> : vector<8x32xf32>
    %31 = tpu.matmul %24, %30, %cst_17 {dimension_numbers = #tpu.dot_dimension_numbers<[1], [0], [0], [1], [0, 0, 1, 1], [], []>} : vector<8x32xbf16>, vector<32x32xbf16>, vector<8x32xf32> -> vector<8x32xf32>
    %c0_18 = arith.constant 0 : index
    %c0_19 = arith.constant 0 : index
    %32 = vector.load %arg8[%c0_18, %c0_19] : memref<1x32xf32, #tpu.memory_space<vmem>>, vector<1x32xf32>
    %33 = vector.broadcast %32 : vector<1x32xf32> to vector<8x32xf32>
    %34 = arith.addf %31, %33 : vector<8x32xf32>
    %35 = arith.truncf %29 : vector<8x32xf32> to vector<8x32xbf16>
    %36 = arith.truncf %34 : vector<8x32xf32> to vector<8x32xbf16>
    %37 = vector.extract_strided_slice %35 {offsets = [0, 0], sizes = [8, 8], strides = [1, 1]} : vector<8x32xbf16> to vector<8x8xbf16>
    %c0_20 = arith.constant 0 : index
    %c0_21 = arith.constant 0 : index
    %c0_22 = arith.constant 0 : index
    %c0_23 = arith.constant 0 : index
    %38 = vector.load %arg9[%c0_20, %c0_21, %c0_22, %c0_23] : memref<1x4x8x8xbf16, #tpu.memory_space<vmem>>, vector<1x1x8x8xbf16>
    %39 = vector.shape_cast %38 : vector<1x1x8x8xbf16> to vector<8x8xbf16>
    %40 = vector.shape_cast %37 : vector<8x8xbf16> to vector<1x1x8x8xbf16>
    tpu.vector_store %arg9[%c0_20, %c0_21, %c0_22, %c0_23], %40 {strides = array<i32>} : memref<1x4x8x8xbf16, #tpu.memory_space<vmem>>, vector<1x1x8x8xbf16>,
    %41 = vector.extract_strided_slice %36 {offsets = [0, 0], sizes = [8, 8], strides = [1, 1]} : vector<8x32xbf16> to vector<8x8xbf16>
    %c0_24 = arith.constant 0 : index
    %c0_25 = arith.constant 0 : index
    %c0_26 = arith.constant 0 : index
    %c0_27 = arith.constant 0 : index
    %42 = vector.load %arg10[%c0_24, %c0_25, %c0_26, %c0_27] : memref<1x4x8x8xbf16, #tpu.memory_space<vmem>>, vector<1x1x8x8xbf16>
    %43 = vector.shape_cast %42 : vector<1x1x8x8xbf16> to vector<8x8xbf16>
    %44 = vector.shape_cast %41 : vector<8x8xbf16> to vector<1x1x8x8xbf16>
    tpu.vector_store %arg10[%c0_24, %c0_25, %c0_26, %c0_27], %44 {strides = array<i32>} : memref<1x4x8x8xbf16, #tpu.memory_space<vmem>>, vector<1x1x8x8xbf16>,
    %45 = vector.extract_strided_slice %35 {offsets = [0, 8], sizes = [8, 8], strides = [1, 1]} : vector<8x32xbf16> to vector<8x8xbf16>
    %c0_28 = arith.constant 0 : index
    %c1 = arith.constant 1 : index
    %c0_29 = arith.constant 0 : index
    %c0_30 = arith.constant 0 : index
    %46 = vector.load %arg9[%c0_28, %c1, %c0_29, %c0_30] : memref<1x4x8x8xbf16, #tpu.memory_space<vmem>>, vector<1x1x8x8xbf16>
    %47 = vector.shape_cast %46 : vector<1x1x8x8xbf16> to vector<8x8xbf16>
    %48 = vector.shape_cast %45 : vector<8x8xbf16> to vector<1x1x8x8xbf16>
    tpu.vector_store %arg9[%c0_28, %c1, %c0_29, %c0_30], %48 {strides = array<i32>} : memref<1x4x8x8xbf16, #tpu.memory_space<vmem>>, vector<1x1x8x8xbf16>,
    %49 = vector.extract_strided_slice %36 {offsets = [0, 8], sizes = [8, 8], strides = [1, 1]} : vector<8x32xbf16> to vector<8x8xbf16>
    %c0_31 = arith.constant 0 : index
    %c1_32 = arith.constant 1 : index
    %c0_33 = arith.constant 0 : index
    %c0_34 = arith.constant 0 : index
    %50 = vector.load %arg10[%c0_31, %c1_32, %c0_33, %c0_34] : memref<1x4x8x8xbf16, #tpu.memory_space<vmem>>, vector<1x1x8x8xbf16>
    %51 = vector.shape_cast %50 : vector<1x1x8x8xbf16> to vector<8x8xbf16>
    %52 = vector.shape_cast %49 : vector<8x8xbf16> to vector<1x1x8x8xbf16>
    tpu.vector_store %arg10[%c0_31, %c1_32, %c0_33, %c0_34], %52 {strides = array<i32>} : memref<1x4x8x8xbf16, #tpu.memory_space<vmem>>, vector<1x1x8x8xbf16>,
    %53 = vector.extract_strided_slice %35 {offsets = [0, 16], sizes = [8, 8], strides = [1, 1]} : vector<8x32xbf16> to vector<8x8xbf16>
    %c0_35 = arith.constant 0 : index
    %c2 = arith.constant 2 : index
    %c0_36 = arith.constant 0 : index
    %c0_37 = arith.constant 0 : index
    %54 = vector.load %arg9[%c0_35, %c2, %c0_36, %c0_37] : memref<1x4x8x8xbf16, #tpu.memory_space<vmem>>, vector<1x1x8x8xbf16>
    %55 = vector.shape_cast %54 : vector<1x1x8x8xbf16> to vector<8x8xbf16>
    %56 = vector.shape_cast %53 : vector<8x8xbf16> to vector<1x1x8x8xbf16>
    tpu.vector_store %arg9[%c0_35, %c2, %c0_36, %c0_37], %56 {strides = array<i32>} : memref<1x4x8x8xbf16, #tpu.memory_space<vmem>>, vector<1x1x8x8xbf16>,
    %57 = vector.extract_strided_slice %36 {offsets = [0, 16], sizes = [8, 8], strides = [1, 1]} : vector<8x32xbf16> to vector<8x8xbf16>
    %c0_38 = arith.constant 0 : index
    %c2_39 = arith.constant 2 : index
    %c0_40 = arith.constant 0 : index
    %c0_41 = arith.constant 0 : index
    %58 = vector.load %arg10[%c0_38, %c2_39, %c0_40, %c0_41] : memref<1x4x8x8xbf16, #tpu.memory_space<vmem>>, vector<1x1x8x8xbf16>
    %59 = vector.shape_cast %58 : vector<1x1x8x8xbf16> to vector<8x8xbf16>
    %60 = vector.shape_cast %57 : vector<8x8xbf16> to vector<1x1x8x8xbf16>
    tpu.vector_store %arg10[%c0_38, %c2_39, %c0_40, %c0_41], %60 {strides = array<i32>} : memref<1x4x8x8xbf16, #tpu.memory_space<vmem>>, vector<1x1x8x8xbf16>,
    %61 = vector.extract_strided_slice %35 {offsets = [0, 24], sizes = [8, 8], strides = [1, 1]} : vector<8x32xbf16> to vector<8x8xbf16>
    %c0_42 = arith.constant 0 : index
    %c3 = arith.constant 3 : index
    %c0_43 = arith.constant 0 : index
    %c0_44 = arith.constant 0 : index
    %62 = vector.load %arg9[%c0_42, %c3, %c0_43, %c0_44] : memref<1x4x8x8xbf16, #tpu.memory_space<vmem>>, vector<1x1x8x8xbf16>
    %63 = vector.shape_cast %62 : vector<1x1x8x8xbf16> to vector<8x8xbf16>
    %64 = vector.shape_cast %61 : vector<8x8xbf16> to vector<1x1x8x8xbf16>
    tpu.vector_store %arg9[%c0_42, %c3, %c0_43, %c0_44], %64 {strides = array<i32>} : memref<1x4x8x8xbf16, #tpu.memory_space<vmem>>, vector<1x1x8x8xbf16>,
    %65 = vector.extract_strided_slice %36 {offsets = [0, 24], sizes = [8, 8], strides = [1, 1]} : vector<8x32xbf16> to vector<8x8xbf16>
    %c0_45 = arith.constant 0 : index
    %c3_46 = arith.constant 3 : index
    %c0_47 = arith.constant 0 : index
    %c0_48 = arith.constant 0 : index
    %66 = vector.load %arg10[%c0_45, %c3_46, %c0_47, %c0_48] : memref<1x4x8x8xbf16, #tpu.memory_space<vmem>>, vector<1x1x8x8xbf16>
    %67 = vector.shape_cast %66 : vector<1x1x8x8xbf16> to vector<8x8xbf16>
    %68 = vector.shape_cast %65 : vector<8x8xbf16> to vector<1x1x8x8xbf16>
    tpu.vector_store %arg10[%c0_45, %c3_46, %c0_47, %c0_48], %68 {strides = array<i32>} : memref<1x4x8x8xbf16, #tpu.memory_space<vmem>>, vector<1x1x8x8xbf16>,
    return
  }
  func.func @transform_0(%arg0: i32, %arg1: i32) -> (i32, i32, i32) {
    %c0_i32 = arith.constant 0 : i32
    %c0_i32_0 = arith.constant 0 : i32
    return %arg0, %arg1, %c0_i32 : i32, i32, i32
  }
  func.func @transform_1(%arg0: i32, %arg1: i32) -> (i32, i32) {
    %c0_i32 = arith.constant 0 : i32
    %c0_i32_0 = arith.constant 0 : i32
    %c0_i32_1 = arith.constant 0 : i32
    return %c0_i32, %c0_i32_0 : i32, i32
  }
  func.func @transform_2(%arg0: i32, %arg1: i32) -> (i32, i32) {
    %c0_i32 = arith.constant 0 : i32
    %c0_i32_0 = arith.constant 0 : i32
    %c0_i32_1 = arith.constant 0 : i32
    return %c0_i32, %c0_i32_0 : i32, i32
  }
  func.func @transform_3(%arg0: i32, %arg1: i32) -> (i32, i32) {
    %c0_i32 = arith.constant 0 : i32
    %c0_i32_0 = arith.constant 0 : i32
    %c0_i32_1 = arith.constant 0 : i32
    return %c0_i32, %c0_i32_0 : i32, i32
  }
  func.func @transform_4(%arg0: i32, %arg1: i32) -> (i32, i32) {
    %c0_i32 = arith.constant 0 : i32
    %c0_i32_0 = arith.constant 0 : i32
    %c0_i32_1 = arith.constant 0 : i32
    return %c0_i32, %c0_i32_0 : i32, i32
  }
  func.func @transform_5(%arg0: i32, %arg1: i32) -> (i32, i32) {
    %c0_i32 = arith.constant 0 : i32
    %c0_i32_0 = arith.constant 0 : i32
    %c0_i32_1 = arith.constant 0 : i32
    return %c0_i32, %c0_i32_0 : i32, i32
  }
  func.func @transform_6(%arg0: i32, %arg1: i32) -> (i32, i32) {
    %c0_i32 = arith.constant 0 : i32
    %c0_i32_0 = arith.constant 0 : i32
    %c0_i32_1 = arith.constant 0 : i32
    return %c0_i32, %c0_i32_0 : i32, i32
  }
  func.func @transform_7(%arg0: i32, %arg1: i32) -> (i32, i32, i32, i32) {
    %c0_i32 = arith.constant 0 : i32
    %c0_i32_0 = arith.constant 0 : i32
    %c0_i32_1 = arith.constant 0 : i32
    return %arg0, %c0_i32, %arg1, %c0_i32_0 : i32, i32, i32, i32
  }
  func.func @transform_8(%arg0: i32, %arg1: i32) -> (i32, i32, i32, i32) {
    %c0_i32 = arith.constant 0 : i32
    %c0_i32_0 = arith.constant 0 : i32
    %c0_i32_1 = arith.constant 0 : i32
    return %arg0, %c0_i32, %arg1, %c0_i32_0 : i32, i32, i32, i32
  }
}

module attributes {stable_mosaic.version = 11 : i64} {
  func.func @_kv_project_kernel(%arg0: i32, %arg1: i32, %arg2: memref<1x8x32xf32, #tpu.memory_space<vmem>>, %arg3: memref<1x32xf32, #tpu.memory_space<vmem>>, %arg4: memref<1x32xf32, #tpu.memory_space<vmem>>, %arg5: memref<32x32xbf16, #tpu.memory_space<vmem>>, %arg6: memref<1x32xf32, #tpu.memory_space<vmem>>, %arg7: memref<32x32xbf16, #tpu.memory_space<vmem>>, %arg8: memref<1x32xf32, #tpu.memory_space<vmem>>, %arg9: memref<1x4x8x8xbf16, #tpu.memory_space<vmem>>, %arg10: memref<1x4x8x8xbf16, #tpu.memory_space<vmem>>) attributes {dimension_semantics = [#tpu.dimension_semantics<parallel>, #tpu.dimension_semantics<parallel>], iteration_bounds = array<i64: 2, 1>, scalar_prefetch = 0 : i64, scratch_operands = 0 : i64, tpu.core_type = #tpu.core_type<tc>, window_params = [{transform_indices = @transform_0, window_bounds = array<i64: 1, 8, 32>}, {pipeline_mode = #tpu.pipeline_mode<synchronous>, transform_indices = @transform_1, window_bounds = array<i64: 1, 32>}, {pipeline_mode = #tpu.pipeline_mode<synchronous>, transform_indices = @transform_2, window_bounds = array<i64: 1, 32>}, {pipeline_mode = #tpu.pipeline_mode<synchronous>, transform_indices = @transform_3, window_bounds = array<i64: 32, 32>}, {pipeline_mode = #tpu.pipeline_mode<synchronous>, transform_indices = @transform_4, window_bounds = array<i64: 1, 32>}, {pipeline_mode = #tpu.pipeline_mode<synchronous>, transform_indices = @transform_5, window_bounds = array<i64: 32, 32>}, {pipeline_mode = #tpu.pipeline_mode<synchronous>, transform_indices = @transform_6, window_bounds = array<i64: 1, 32>}, {transform_indices = @transform_7, window_bounds = array<i64: 1, 4, 8, 8>}, {transform_indices = @transform_8, window_bounds = array<i64: 1, 4, 8, 8>}]} {
    %c0 = arith.constant 0 : index
    %c0_0 = arith.constant 0 : index
    %c0_1 = arith.constant 0 : index
    %0 = vector.load %arg2[%c0, %c0_0, %c0_1] : memref<1x8x32xf32, #tpu.memory_space<vmem>>, vector<1x8x32xf32>
    %1 = vector.shape_cast %0 : vector<1x8x32xf32> to vector<8x32xf32>
    %c0_2 = arith.constant 0 : index
    %c0_3 = arith.constant 0 : index
    %2 = vector.load %arg3[%c0_2, %c0_3] : memref<1x32xf32, #tpu.memory_space<vmem>>, vector<1x32xf32>
    %c0_4 = arith.constant 0 : index
    %c0_5 = arith.constant 0 : index
    %3 = vector.load %arg4[%c0_4, %c0_5] : memref<1x32xf32, #tpu.memory_space<vmem>>, vector<1x32xf32>
    %cst = arith.constant dense<0.000000e+00> : vector<8xf32>
    %4 = vector.multi_reduction <add>, %1, %cst [1] : vector<8x32xf32> to vector<8xf32>
    %5 = vector.shape_cast %4 : vector<8xf32> to vector<8x1xf32>
    %cst_6 = arith.constant 3.200000e+01 : f32
    %6 = vector.broadcast %cst_6 : f32 to vector<8x1xf32>
    %7 = arith.divf %5, %6 : vector<8x1xf32>
    %8 = vector.broadcast %7 : vector<8x1xf32> to vector<8x32xf32>
    %9 = arith.subf %1, %8 : vector<8x32xf32>
    %10 = arith.mulf %9, %9 : vector<8x32xf32>
    %cst_7 = arith.constant dense<0.000000e+00> : vector<8xf32>
    %11 = vector.multi_reduction <add>, %10, %cst_7 [1] : vector<8x32xf32> to vector<8xf32>
    %12 = vector.shape_cast %11 : vector<8xf32> to vector<8x1xf32>
    %cst_8 = arith.constant 3.200000e+01 : f32
    %13 = vector.broadcast %cst_8 : f32 to vector<8x1xf32>
    %14 = arith.divf %12, %13 : vector<8x1xf32>
    %cst_9 = arith.constant 9.99999974E-6 : f32
    %15 = vector.broadcast %cst_9 : f32 to vector<8x1xf32>
    %16 = arith.addf %14, %15 : vector<8x1xf32>
    %17 = math.rsqrt %16 : vector<8x1xf32>
    %18 = vector.broadcast %17 : vector<8x1xf32> to vector<8x32xf32>
    %19 = arith.mulf %9, %18 : vector<8x32xf32>
    %20 = vector.broadcast %2 : vector<1x32xf32> to vector<8x32xf32>
    %21 = arith.mulf %19, %20 : vector<8x32xf32>
    %22 = vector.broadcast %3 : vector<1x32xf32> to vector<8x32xf32>
    %23 = arith.addf %21, %22 : vector<8x32xf32>
    %24 = arith.truncf %23 : vector<8x32xf32> to vector<8x32xbf16>
    %c0_10 = arith.constant 0 : index
    %c0_11 = arith.constant 0 : index
    %25 = vector.load %arg5[%c0_10, %c0_11] : memref<32x32xbf16, #tpu.memory_space<vmem>>, vector<32x32xbf16>
    %cst_12 = arith.constant dense<0.000000e+00> : vector<8x32xf32>
    %26 = tpu.matmul %24, %25, %cst_12 {dimension_numbers = #tpu.dot_dimension_numbers<[1], [0], [0], [1], [0, 0, 1, 1], [], []>} : vector<8x32xbf16>, vector<32x32xbf16>, vector<8x32xf32> -> vector<8x32xf32>
    %c0_13 = arith.constant 0 : index
    %c0_14 = arith.constant 0 : index
    %27 = vector.load %arg6[%c0_13, %c0_14] : memref<1x32xf32, #tpu.memory_space<vmem>>, vector<1x32xf32>
    %28 = vector.broadcast %27 : vector<1x32xf32> to vector<8x32xf32>
    %29 = arith.addf %26, %28 : vector<8x32xf32>
    %c0_15 = arith.constant 0 : index
    %c0_16 = arith.constant 0 : index
    %30 = vector.load %arg7[%c0_15, %c0_16] : memref<32x32xbf16, #tpu.memory_space<vmem>>, vector<32x32xbf16>
    %cst_17 = arith.constant dense<0.000000e+00> : vector<8x32xf32>
    %31 = tpu.matmul %24, %30, %cst_17 {dimension_numbers = #tpu.dot_dimension_numbers<[1], [0], [0], [1], [0, 0, 1, 1], [], []>} : vector<8x32xbf16>, vector<32x32xbf16>, vector<8x32xf32> -> vector<8x32xf32>
    %c0_18 = arith.constant 0 : index
    %c0_19 = arith.constant 0 : index
    %32 = vector.load %arg8[%c0_18, %c0_19] : memref<1x32xf32, #tpu.memory_space<vmem>>, vector<1x32xf32>
    %33 = vector.broadcast %32 : vector<1x32xf32> to vector<8x32xf32>
    %34 = arith.addf %31, %33 : vector<8x32xf32>
    %35 = arith.truncf %29 : vector<8x32xf32> to vector<8x32xbf16>
    %36 = arith.truncf %34 : vector<8x32xf32> to vector<8x32xbf16>
    %37 = vector.extract_strided_slice %35 {offsets = [0, 0], sizes = [8, 8], strides = [1, 1]} : vector<8x32xbf16> to vector<8x8xbf16>
    %c0_20 = arith.constant 0 : index
    %c0_21 = arith.constant 0 : index
    %c0_22 = arith.constant 0 : index
    %c0_23 = arith.constant 0 : index
    %38 = vector.load %arg9[%c0_20, %c0_21, %c0_22, %c0_23] : memref<1x4x8x8xbf16, #tpu.memory_space<vmem>>, vector<1x1x8x8xbf16>
    %39 = vector.shape_cast %38 : vector<1x1x8x8xbf16> to vector<8x8xbf16>
    %40 = vector.shape_cast %37 : vector<8x8xbf16> to vector<1x1x8x8xbf16>
    tpu.vector_store %arg9[%c0_20, %c0_21, %c0_22, %c0_23], %40 {strides = array<i32>} : memref<1x4x8x8xbf16, #tpu.memory_space<vmem>>, vector<1x1x8x8xbf16>,
    %41 = vector.extract_strided_slice %36 {offsets = [0, 0], sizes = [8, 8], strides = [1, 1]} : vector<8x32xbf16> to vector<8x8xbf16>
    %c0_24 = arith.constant 0 : index
    %c0_25 = arith.constant 0 : index
    %c0_26 = arith.constant 0 : index
    %c0_27 = arith.constant 0 : index
    %42 = vector.load %arg10[%c0_24, %c0_25, %c0_26, %c0_27] : memref<1x4x8x8xbf16, #tpu.memory_space<vmem>>, vector<1x1x8x8xbf16>
    %43 = vector.shape_cast %42 : vector<1x1x8x8xbf16> to vector<8x8xbf16>
    %44 = vector.shape_cast %41 : vector<8x8xbf16> to vector<1x1x8x8xbf16>
    tpu.vector_store %arg10[%c0_24, %c0_25, %c0_26, %c0_27], %44 {strides = array<i32>} : memref<1x4x8x8xbf16, #tpu.memory_space<vmem>>, vector<1x1x8x8xbf16>,
    %45 = vector.extract_strided_slice %35 {offsets = [0, 8], sizes = [8, 8], strides = [1, 1]} : vector<8x32xbf16> to vector<8x8xbf16>
    %c0_28 = arith.constant 0 : index
    %c1 = arith.constant 1 : index
    %c0_29 = arith.constant 0 : index
    %c0_30 = arith.constant 0 : index
    %46 = vector.load %arg9[%c0_28, %c1, %c0_29, %c0_30] : memref<1x4x8x8xbf16, #tpu.memory_space<vmem>>, vector<1x1x8x8xbf16>
    %47 = vector.shape_cast %46 : vector<1x1x8x8xbf16> to vector<8x8xbf16>
    %48 = vector.shape_cast %45 : vector<8x8xbf16> to vector<1x1x8x8xbf16>
    tpu.vector_store %arg9[%c0_28, %c1, %c0_29, %c0_30], %48 {strides = array<i32>} : memref<1x4x8x8xbf16, #tpu.memory_space<vmem>>, vector<1x1x8x8xbf16>,
    %49 = vector.extract_strided_slice %36 {offsets = [0, 8], sizes = [8, 8], strides = [1, 1]} : vector<8x32xbf16> to vector<8x8xbf16>
    %c0_31 = arith.constant 0 : index
    %c1_32 = arith.constant 1 : index
    %c0_33 = arith.constant 0 : index
    %c0_34 = arith.constant 0 : index
    %50 = vector.load %arg10[%c0_31, %c1_32, %c0_33, %c0_34] : memref<1x4x8x8xbf16, #tpu.memory_space<vmem>>, vector<1x1x8x8xbf16>
    %51 = vector.shape_cast %50 : vector<1x1x8x8xbf16> to vector<8x8xbf16>
    %52 = vector.shape_cast %49 : vector<8x8xbf16> to vector<1x1x8x8xbf16>
    tpu.vector_store %arg10[%c0_31, %c1_32, %c0_33, %c0_34], %52 {strides = array<i32>} : memref<1x4x8x8xbf16, #tpu.memory_space<vmem>>, vector<1x1x8x8xbf16>,
    %53 = vector.extract_strided_slice %35 {offsets = [0, 16], sizes = [8, 8], strides = [1, 1]} : vector<8x32xbf16> to vector<8x8xbf16>
    %c0_35 = arith.constant 0 : index
    %c2 = arith.constant 2 : index
    %c0_36 = arith.constant 0 : index
    %c0_37 = arith.constant 0 : index
    %54 = vector.load %arg9[%c0_35, %c2, %c0_36, %c0_37] : memref<1x4x8x8xbf16, #tpu.memory_space<vmem>>, vector<1x1x8x8xbf16>
    %55 = vector.shape_cast %54 : vector<1x1x8x8xbf16> to vector<8x8xbf16>
    %56 = vector.shape_cast %53 : vector<8x8xbf16> to vector<1x1x8x8xbf16>
    tpu.vector_store %arg9[%c0_35, %c2, %c0_36, %c0_37], %56 {strides = array<i32>} : memref<1x4x8x8xbf16, #tpu.memory_space<vmem>>, vector<1x1x8x8xbf16>,
    %57 = vector.extract_strided_slice %36 {offsets = [0, 16], sizes = [8, 8], strides = [1, 1]} : vector<8x32xbf16> to vector<8x8xbf16>
    %c0_38 = arith.constant 0 : index
    %c2_39 = arith.constant 2 : index
    %c0_40 = arith.constant 0 : index
    %c0_41 = arith.constant 0 : index
    %58 = vector.load %arg10[%c0_38, %c2_39, %c0_40, %c0_41] : memref<1x4x8x8xbf16, #tpu.memory_space<vmem>>, vector<1x1x8x8xbf16>
    %59 = vector.shape_cast %58 : vector<1x1x8x8xbf16> to vector<8x8xbf16>
    %60 = vector.shape_cast %57 : vector<8x8xbf16> to vector<1x1x8x8xbf16>
    tpu.vector_store %arg10[%c0_38, %c2_39, %c0_40, %c0_41], %60 {strides = array<i32>} : memref<1x4x8x8xbf16, #tpu.memory_space<vmem>>, vector<1x1x8x8xbf16>,
    %61 = vector.extract_strided_slice %35 {offsets = [0, 24], sizes = [8, 8], strides = [1, 1]} : vector<8x32xbf16> to vector<8x8xbf16>
    %c0_42 = arith.constant 0 : index
    %c3 = arith.constant 3 : index
    %c0_43 = arith.constant 0 : index
    %c0_44 = arith.constant 0 : index
    %62 = vector.load %arg9[%c0_42, %c3, %c0_43, %c0_44] : memref<1x4x8x8xbf16, #tpu.memory_space<vmem>>, vector<1x1x8x8xbf16>
    %63 = vector.shape_cast %62 : vector<1x1x8x8xbf16> to vector<8x8xbf16>
    %64 = vector.shape_cast %61 : vector<8x8xbf16> to vector<1x1x8x8xbf16>
    tpu.vector_store %arg9[%c0_42, %c3, %c0_43, %c0_44], %64 {strides = array<i32>} : memref<1x4x8x8xbf16, #tpu.memory_space<vmem>>, vector<1x1x8x8xbf16>,
    %65 = vector.extract_strided_slice %36 {offsets = [0, 24], sizes = [8, 8], strides = [1, 1]} : vector<8x32xbf16> to vector<8x8xbf16>
    %c0_45 = arith.constant 0 : index
    %c3_46 = arith.constant 3 : index
    %c0_47 = arith.constant 0 : index
    %c0_48 = arith.constant 0 : index
    %66 = vector.load %arg10[%c0_45, %c3_46, %c0_47, %c0_48] : memref<1x4x8x8xbf16, #tpu.memory_space<vmem>>, vector<1x1x8x8xbf16>
    %67 = vector.shape_cast %66 : vector<1x1x8x8xbf16> to vector<8x8xbf16>
    %68 = vector.shape_cast %65 : vector<8x8xbf16> to vector<1x1x8x8xbf16>
    tpu.vector_store %arg10[%c0_45, %c3_46, %c0_47, %c0_48], %68 {strides = array<i32>} : memref<1x4x8x8xbf16, #tpu.memory_space<vmem>>, vector<1x1x8x8xbf16>,
    return
  }
  func.func @transform_0(%arg0: i32, %arg1: i32) -> (i32, i32, i32) {
    %c0_i32 = arith.constant 0 : i32
    %c0_i32_0 = arith.constant 0 : i32
    return %arg0, %arg1, %c0_i32 : i32, i32, i32
  }
  func.func @transform_1(%arg0: i32, %arg1: i32) -> (i32, i32) {
    %c0_i32 = arith.constant 0 : i32
    %c0_i32_0 = arith.constant 0 : i32
    %c0_i32_1 = arith.constant 0 : i32
    return %c0_i32, %c0_i32_0 : i32, i32
  }
  func.func @transform_2(%arg0: i32, %arg1: i32) -> (i32, i32) {
    %c0_i32 = arith.constant 0 : i32
    %c0_i32_0 = arith.constant 0 : i32
    %c0_i32_1 = arith.constant 0 : i32
    return %c0_i32, %c0_i32_0 : i32, i32
  }
  func.func @transform_3(%arg0: i32, %arg1: i32) -> (i32, i32) {
    %c0_i32 = arith.constant 0 : i32
    %c0_i32_0 = arith.constant 0 : i32
    %c0_i32_1 = arith.constant 0 : i32
    return %c0_i32, %c0_i32_0 : i32, i32
  }
  func.func @transform_4(%arg0: i32, %arg1: i32) -> (i32, i32) {
    %c0_i32 = arith.constant 0 : i32
    %c0_i32_0 = arith.constant 0 : i32
    %c0_i32_1 = arith.constant 0 : i32
    return %c0_i32, %c0_i32_0 : i32, i32
  }
  func.func @transform_5(%arg0: i32, %arg1: i32) -> (i32, i32) {
    %c0_i32 = arith.constant 0 : i32
    %c0_i32_0 = arith.constant 0 : i32
    %c0_i32_1 = arith.constant 0 : i32
    return %c0_i32, %c0_i32_0 : i32, i32
  }
  func.func @transform_6(%arg0: i32, %arg1: i32) -> (i32, i32) {
    %c0_i32 = arith.constant 0 : i32
    %c0_i32_0 = arith.constant 0 : i32
    %c0_i32_1 = arith.constant 0 : i32
    return %c0_i32, %c0_i32_0 : i32, i32
  }
  func.func @transform_7(%arg0: i32, %arg1: i32) -> (i32, i32, i32, i32) {
    %c0_i32 = arith.constant 0 : i32
    %c0_i32_0 = arith.constant 0 : i32
    %c0_i32_1 = arith.constant 0 : i32
    return %arg0, %c0_i32, %arg1, %c0_i32_0 : i32, i32, i32, i32
  }
  func.func @transform_8(%arg0: i32, %arg1: i32) -> (i32, i32, i32, i32) {
    %c0_i32 = arith.constant 0 : i32
    %c0_i32_0 = arith.constant 0 : i32
    %c0_i32_1 = arith.constant 0 : i32
    return %arg0, %c0_i32, %arg1, %c0_i32_0 : i32, i32, i32, i32
  }
}

</mosaic_0001>

<bundles_post_ra>
// kernel: tpu_custom_call.1
= control target key start
LH: loop header
LB: loop body
LE: loop exit
PB: predicated region body
PF: predicated region fallthrough
CT: control target
= control target key end

     0   :  { %s1424_s0 = inlined_call_operand.hbm [shape: f32[2,8,32], index: 0, kind: input, shape index: {}]   ;;  %s1425_s1 = inlined_call_operand.hbm [shape: f32[1,32], index: 1, kind: input, shape index: {}]   ;;  %s1426_s2 = inlined_call_operand.vmem [shape: f32[1,32], index: 2, kind: input, shape index: {}]   ;;  %s1427_s3 = inlined_call_operand.hbm [shape: bf16[32,32], index: 3, kind: input, shape index: {}]   ;;  %s1428_s4 = inlined_call_operand.vmem [shape: f32[1,32], index: 4, kind: input, shape index: {}]   ;;  %s1429_s5 = inlined_call_operand.hbm [shape: bf16[32,32], index: 5, kind: input, shape index: {}]   ;;  %s1430_s6 = inlined_call_operand.vmem [shape: f32[1,32], index: 6, kind: input, shape index: {}]   ;;  %s1431_s7 = inlined_call_operand.hbm [shape: bf16[2,4,8,8], index: 7, kind: output, shape index: {0}]   ;;  %s1432_s8 = inlined_call_operand.hbm [shape: bf16[2,4,8,8], index: 8, kind: output, shape index: {1}]  }
   0x1   :  { %1434 = sst [smem:[#allocation19_spill]] %s1425_s1 }
   0x2   :  { %1435 = sst [smem:[#allocation20_spill]] %s1427_s3 }
   0x3   :  { %1436 = sst [smem:[#allocation21_spill]] %s1429_s5 }
   0x4   :  { %14 = vsyncpa [#allocation3], 0 }
   0x5   :  { %16 = vsyncpa [#allocation3 + $0x1], 0 }
   0x6   :  { %17 = vsyncpa [#allocation6], 0 }
   0x7   :  { %18 = vsyncpa [#allocation9], 0 }
   0x8   :  { %19 = vsyncpa [#allocation4], 0 }
   0x9   :  { %21 = vsyncpa [#allocation4 + $0x1], 0 }
   0xa   :  { %22 = vsyncpa [#allocation12], 0 }
   0xb   :  { %24 = vsyncpa [#allocation12 + $0x1], 0  ;;  %s1206_s27 = smov 0   ;;  %s1208_s28 = smov 0  }
   0xc   :  { %s1210_s29 = smov 0   ;;  %s1212_s30 = smov 0  }
   0xd   :  { %s1214_s9 = smov 0   ;;  %s1216_s10 = smov 0  }
   0xe LB: > { %s738_s11 = sadd.s32 4294967295, %s1148_s10   ;;  %s739_s12 = sadd.s32 4294967294, %s1148_s10   ;;  %s1148_s10 = sphi %s1216_s10, %s30_s10   ;;  %s1144_s9 = sphi %s1214_s9, %s1454_s9   ;;  %s1140_s30 = sphi %s1212_s30, %s1453_s30   ;;  %s1136_s29 = sphi %s1210_s29, %s1452_s29   ;;  %s1132_s28 = sphi %s1208_s28, %s1451_s28   ;;  %s1128_s27 = sphi %s1206_s27, %s1450_s27  }
   0xf   : > { %p64_p0 = scmp.ne.s32.totalorder %s1132_s28, %s1128_s27  ;;  %p1240_p1 = scmp.eq.s32.totalorder %s738_s11, 0 }
  0x10   : > { %p1244_p2 = scmp.eq.s32.totalorder %s738_s11, 1  ;;  %p222_p3 = scmp.eq.s32.totalorder %s739_s12, 1 }
  0x11   : > { %p1250_p4 = por %p1240_p1, %p64_p0  ;;  %p740_p5 = scmp.ge.s32.totalorder %s1148_s10, 1 }
  0x12   : > { %p1255_p6 = por %p222_p3, %p64_p0  ;;  %p257_p7 = scmp.lt.s32.totalorder %s1148_s10, 3 }
  0x13   : > { %s1442_s1 = sld [smem:[#allocation19_spill]]  ;;  %p744_p9 = scmp.ge.s32.totalorder %s1148_s10, 2 }
  0x14   : > { %s1440_s16 = scalar_select %p1255_p6, 1, 0 }
  0x15   : > { %p1263_p8 = pnand %p740_p5, %p257_p7  ;;  %s1150_s21 = smov [#allocation5]  }
  0x16   : > { %1441 = sst [smem:[#allocation18_spill]] %s1440_s16  ;;  %s271_s22 = sshll.u32 %s1150_s21, 4  ;;  %s272_s22 = int_to_ptr.vmem [resolvable:$true] %s271_s22 }
  0x17   : > { %p810_p10 = pneg %p1263_p8  ;;  %s1444_s3 = sld [smem:[#allocation20_spill]] }
  0x18   : > { %s1151_s11 = smov [#allocation7]   ;;  %s1152_s17 = smov 64  }
  0x19   : > { %s269_s19 = sshll.u32 %s1442_s1, 4  ;;  %p1275_p11 = pnand %p810_p10, %p1240_p1  ;;  %s270_s19 = int_to_ptr.hbm [resolvable:$true] %s269_s19 }
  0x1a   : > { %s285_s12 = sshll.u32 %s1151_s11, 4  ;;  %s1153_s18 = smov 4   ;;  %s286_s12 = int_to_ptr.vmem [resolvable:$true] %s285_s12 }
  0x1b   : > { %813 = dma.hbm_to_vmem [thread:$0]  (!%p1275_p11), %s270_s19, 16, %s272_s22, [#allocation6]  }
  0x1c   : > { %s1446_s5 = sld [smem:[#allocation21_spill]]  ;;  %s1154_s1 = smov [#allocation8]  }
  0x1d   : > { %s283_s25 = sshll.u32 %s1444_s3, 4  ;;  %s302_s3 = sshll.u32 %s1154_s1, 4  ;;  %s284_s25 = int_to_ptr.hbm [resolvable:$true] %s283_s25  ;;  %s303_s3 = int_to_ptr.vmem [resolvable:$true] %s302_s3 }
  0x1e   : > { %816 = dma.hbm_to_vmem [thread:$0]  (!%p1275_p11), %s284_s25, 256, %s286_s12, [#allocation6], %s1152_s17, %s1152_s17, %s1153_s18  }
  0x1f   : > { %s51_s19 = sadd.s32 1, %s1136_s29  ;;  %s42_s22 = sadd.s32 1, %s1144_s9 }
  0x20   : > { %p58_p12 = scmp.ne.s32.totalorder %s1136_s29, %s1132_s28  ;;  %p44_p13 = scmp.ge.s32.totalorder %s42_s22, 2 }
  0x21   : > { %p59_p0 = scmp.eq.s32.totalorder %s1148_s10, 0  ;;  %p834_p5 = scmp.lt.s32.totalorder %s1148_s10, 2 }
  0x22   : > { %s300_s24 = sshll.u32 %s1446_s5, 4  ;;  %p1295_p3 = por %p1244_p2, %p58_p12  ;;  %s301_s24 = int_to_ptr.hbm [resolvable:$true] %s300_s24 }
  0x23   : > { %819 = dma.hbm_to_vmem [thread:$0]  (!%p1275_p11), %s301_s24, 256, %s303_s3, [#allocation9], %s1152_s17, %s1152_s17, %s1153_s18  }
  0x24   : > { %s1456_s22 = smov (%p44_p13, %s42_s22), 0  ;;  %p1302_p7 = por %p59_p0, %p58_p12 }
  0x25   : > { %s319_s3 = sand.u32 1, %s1136_s29   ;;  %s46_s26 = ssub.s32 %s1144_s9, %s1456_s22 }
  0x26   : > { %p49_p10 = scmp.eq.s32.totalorder %s46_s26, 0  ;;  %s745_s11 = sshll.u32 %s319_s3, 3 }
  0x27   : > { %s746_s12 = sshll.u32 %s1144_s9, 3  ;;  %s323_s23 = scalar_lea.vmem [#allocation2], %s745_s11 }
  0x28   : > { %s1311_s14 = scalar_select %p49_p10, %s1136_s29, %s51_s19  }
  0x29   : > { %s328_s21 = scalar_lea.hbm %s1424_s0, %s746_s12  ;;  %s332_s24 = sshll.u32 %s323_s23, 4  ;;  %s333_s24 = int_to_ptr.vmem [resolvable:$true] %s332_s24 }
  0x2a   : > { %s330_s5 = sshll.u32 %s328_s21, 4  ;;  %p821_p2 = pnand %p834_p5, %p1302_p7  ;;  %s331_s5 = int_to_ptr.hbm [resolvable:$true] %s330_s5 }
  0x2b   : > { %s320_s16 = scalar_lea.sflag [#allocation3], %s319_s3  ;;  %341 = sbr.rel (%p1263_p8) target bundleno = 589 (0x24d), region = 48 }
  0x2c   : > { %823 = dma.hbm_to_vmem [thread:$0]  (!%p821_p2), %s331_s5, 128, %s333_s24, %s320_s16  }
  0x2d   : > { %s1323_s19 = sand.u32 (!%p1263_p8), 1, %s1132_s28  }
  0x2e   : > { %s748_s26 = sshll.u32 (!%p1263_p8), %s1323_s19, 3  ;;  %s344_s11 = scalar_lea.sflag (!%p1263_p8), [#allocation3], %s1323_s19 }
  0x2f   : > { %s347_s12 = scalar_lea.vmem (!%p1263_p8), [#allocation2], %s748_s26 }
  0x30   : > { %1107 = dma.done.wait (%p1250_p4), %s344_s11, 128  }
  0x31   : > { %1109 = vsyncadd (%p1250_p4), %s344_s11, 4294967168 }
  0x32   : > { %1111 = dma.done.wait (%p1240_p1), [#allocation6], 272  }
  0x33   : > { %1113 = vsyncadd (%p1240_p1), [#allocation6], 4294967024 }
  0x34   : > { %1115 = dma.done.wait (%p1240_p1), [#allocation9], 256  }
  0x35   : > { %1117 = vsyncadd (%p1240_p1), [#allocation9], 4294967040  ;;  %vm405_vm0 = vcmask 261120   ;;  %v402_v0 = vld [vmem:[%s347_s12] sm:$0xff]  ;;  %v1155_v2 = vmov 32.0   ;;  %v786_v16 = vld [vmem:[#allocation7] sm:$0xff] }
  0x36   : > { %v406_v1 = vsel %vm405_vm0, %v402_v0, 0.0  ;;  %902 = vrcp.f32 %v1155_v2  ;;  %v787_v14 = vld [vmem:[#allocation7 + $0x8] sm:$0xff]  ;;  %v789_v15 = vld [vmem:[#allocation8 + $0x8] sm:$0xff]  ;;  %v788_v17 = vld [vmem:[#allocation8] sm:$0xff]  ;;  %s752_s3 = sshll.u32 %s1323_s19, 4  ;;  %vm515_vm5 = vcmask 60416  }
  0x37   : > { %407 = vadd.xlane.f32.xlu0 %v406_v1  ;;  %473 = vmatpush.bf16.msra.mxu0 %v787_v14  ;;  %v898_v27 = vld [vmem:[#allocation5] ss:$0 sm:$0xff]  ;;  %v899_v30 = vld [vmem:[%s1426_s2] ss:$0 sm:$0xff]  ;;  %s393_s17 = scalar_lea.vmem [#allocation10], %s752_s3  ;;  %s1156_s18 = smov 104  }
  0x38   : > { %506 = vmatpush.bf16.msra.mxu1 %v789_v15  ;;  %v900_v34 = vld [vmem:[%s1428_s4] ss:$0 sm:$0xff]  ;;  %s1157_s21 = smov 112   ;;  %s1354_s23 = scalar_lea.vmem [#allocation11], %s752_s3 }
  0x39   : > { %v901_v35 = vld [vmem:[%s1430_s6] ss:$0 sm:$0xff]  ;;  %s1158_s24 = smov 120   ;;  %s790_s26 = sshll.u32 %s1140_s30, 4 }
  0x3a   : > { %s568_s5 = scalar_lea.hbm %s1431_s7, %s790_s26  ;;  %s569_s13 = sshll.u32 %s393_s17, 4  ;;  %s570_s13 = int_to_ptr.vmem [resolvable:$true] %s569_s13 }
  0x3b   : > { %474 = vmatpush.bf16.msra.mxu0 %v786_v16  ;;  %s571_s15 = sshll.u32 %s568_s5, 4  ;;  %s551_s16 = scalar_lea.sflag [#allocation4], %s1323_s19  ;;  %s572_s15 = int_to_ptr.hbm [resolvable:$true] %s571_s15 }
  0x3c   : > { %v903_v3 = vpop.eup %902  ;;  %507 = vmatpush.bf16.msra.mxu1 %v788_v17  ;;  %s1040_s20 = sshra.s32 %s572_s15, 4  ;;  %s1041_s20 = int_to_ptr.hbm [resolvable:$true] %s1040_s20 }
  0x3d   : > { %v410_v4 = vmul.f32 32.0, %v903_v3  ;;  %vm414_vm1 = vweird.f32 %v903_v3  ;;  %s1042_s1 = scalar_lea.hbm %s1041_s20, 16  ;;  %p1047_p11 = scmp.lt.s32.totalorder %s1041_s20, %s1431_s7 }
  0x3e   : > { %p1043_p1 = scmp.ne.s32.totalorder %s1041_s20, %s1042_s1 }
  0x3f   : > { %v411_v5 = vsub.f32 1.0, %v410_v4 }
  0x40   : > { %p1044_p4 = pnand %p1043_p1, %p1295_p3 }
  0x41   : > { %v412_v6 = vmul.f32 %v903_v3, %v411_v5 }
  0x42   : > { %p1045_p8 = pneg %p1044_p4 }
  0x43   : > { %v413_v7 = vadd.f32 %v903_v3, %v412_v6 }
  0x45   : > { %v415_v8 = vsel %vm414_vm1, %v903_v3, %v413_v7 }
  0xaa   : > { %v408_v9 = vpop.xlane.xlu0 %407 }
  0xab   : > { %v416_v10 = vmul.f32 %v415_v8, %v408_v9 }
  0xad   : > { %v417_v11 = vsub.f32 %v402_v0, %v416_v10 }
  0xaf   : > { %v418_v12 = vmul.f32 %v417_v11, %v417_v11 }
  0xb1   : > { %v419_v13 = vsel %vm405_vm0, %v418_v12, 0.0 }
  0xb2   : > { %420 = vadd.xlane.f32.xlu0 %v419_v13 }
 0x125   : > { %v421_v18 = vpop.xlane.xlu0 %420 }
 0x126   : > { %v422_v19 = vmul.f32 %v421_v18, %v415_v8 }
 0x128   : > { %v423_v20 = vadd.f32 1e-05, %v422_v19 }
 0x12a   : > { %904 = vrsqrt.f32 %v423_v20  ;;  %vm430_vm3 = vweird.f32 %v423_v20 }
 0x130   : > { %v905_v21 = vpop.eup %904 }
 0x131   : > { %v425_v22 = vmul.f32 %v905_v21, %v423_v20  ;;  %vm431_vm2 = vweird.f32 %v905_v21 }
 0x132   : > { %vm432_vm4 = vmor %vm430_vm3, %vm431_vm2 }
 0x133   : > { %v426_v23 = vmul.f32 %v905_v21, %v425_v22 }
 0x135   : > { %v427_v24 = vmul.f32 0.5, %v426_v23 }
 0x137   : > { %v428_v25 = vsub.f32 1.5, %v427_v24 }
 0x139   : > { %v429_v26 = vmul.f32 %v905_v21, %v428_v25 }
 0x13b   : > { %v433_v28 = vsel %vm432_vm4, %v905_v21, %v429_v26 }
 0x13c   : > { %v434_v29 = vmul.f32 %v433_v28, %v417_v11 }
 0x13e   : > { %v438_v31 = vmul.f32 %v898_v27, %v434_v29 }
 0x140   : > { %v442_v32 = vadd.f32 %v899_v30, %v438_v31 }
 0x142   : > { %v443_v33 = vpack.c.bf16 %v442_v32, %v442_v32 }
 0x144   : > { %762 = vmatmul.msk.bf16.vlgmr.msra.gmra.mxu0 %vm405_vm0, %v443_v33  ;;  %771 = vmatmul.msk.bf16.vlgmr.msra.gmra.mxu1 %vm405_vm0, %v443_v33 }
 0x1c1   : > { %v476_v36 = vpop.f32.mrf.mxu0  ;;  %v509_v37 = vpop.f32.mrf.mxu1 }
 0x1c2   : > { %v477_v38 = vadd.f32 %v900_v34, %v476_v36  ;;  %v510_v39 = vadd.f32 %v901_v35, %v509_v37 }
 0x1c4   : > { %v513_v40 = vpack.c.bf16 %v477_v38, %v477_v38  ;;  %v514_v41 = vpack.c.bf16 %v510_v39, %v510_v39 }
 0x1c6   : > { %516 = vst.msk [vmem:[%s393_s17] sm:$0xf] %vm515_vm5, %v513_v40  ;;  %540 = vrot.lane.b32.xlu0 %v513_v40, %s1156_s18  ;;  %530 = vrot.lane.b32.xlu2 %v513_v40, %s1157_s21 }
 0x1c7   : > { %517 = vst.msk [vmem:[%s1354_s23] sm:$0xf] %vm515_vm5, %v514_v41  ;;  %519 = vrot.lane.b32.xlu1 %v513_v40, %s1158_s24 }
 0x1c9   : > { %v478_v42 = vpop.f32.mrf.mxu0  ;;  %v511_v43 = vpop.f32.mrf.mxu1 }
 0x1ce   : > { %535 = vrot.lane.b32.xlu2 %v514_v41, %s1157_s21  ;;  %s1046_s21 = scalar_lea.hbm %s1431_s7, 32 }
 0x1cf   : > { %525 = vrot.lane.b32.xlu1 %v514_v41, %s1158_s24  ;;  %p1048_p12 = scmp.lt.s32.totalorder %s1046_s21, %s1042_s1 }
 0x1d1   : > { %p1049_p13 = por %p1048_p12, %p1047_p11 }
 0x1d3   : > { %p1050_p0 = pnand %p1049_p13, %p1045_p8 }
 0x1d7   : > { %545 = vrot.lane.b32.xlu1 %v514_v41, %s1156_s18 }
 0x220   : > { %v531_v44 = vpop.permute.xlu2 %530 }
 0x221   : > { %774 = vst.msk [vmem:[%s393_s17 + $0x8] sm:$0xf] %vm515_vm5, %v531_v44 }
 0x228   : > { %v536_v45 = vpop.permute.xlu2 %535 }
 0x229   : > { %775 = vst.msk [vmem:[%s1354_s23 + $0x8] sm:$0xf] %vm515_vm5, %v536_v45 }
 0x238   : > { %v541_v46 = vpop.permute.xlu0 %540 }
 0x239   : > { %776 = vst.msk [vmem:[%s393_s17 + $0xc] sm:$0xf] %vm515_vm5, %v541_v46  ;;  %v520_v47 = vpop.permute.xlu1 %519 }
 0x23a   : > { %772 = vst.msk [vmem:[%s393_s17 + $0x4] sm:$0xf] %vm515_vm5, %v520_v47 }
 0x23b   : > { %1053 = shalt.err (!%p1050_p0)
}
 0x23c   : > { %s1159_s17 = smov 64   ;;  %s1160_s12 = smov 4  }
 0x23d   : > { %806 = dma.vmem_to_hbm [thread:$0]  (%p1295_p3), %s570_s13, 256, %s572_s15, %s551_s16, %s1159_s17, %s1159_s17, %s1160_s12  }
 0x23e   : > { %s586_s1 = scalar_lea.hbm %s1432_s8, %s790_s26  ;;  %s587_s3 = sshll.u32 %s1354_s23, 4  ;;  %s588_s3 = int_to_ptr.vmem [resolvable:$true] %s587_s3 }
 0x23f   : > { %s589_s18 = sshll.u32 %s586_s1, 4  ;;  %s556_s21 = scalar_lea.sflag [#allocation12], %s1323_s19  ;;  %s590_s18 = int_to_ptr.hbm [resolvable:$true] %s589_s18 }
 0x240   : > { %s1068_s24 = sshra.s32 %s590_s18, 4  ;;  %s1074_s15 = scalar_lea.hbm %s1432_s8, 32  ;;  %s1069_s24 = int_to_ptr.hbm [resolvable:$true] %s1068_s24 }
 0x241   : > { %v526_v48 = vpop.permute.xlu1 %525  ;;  %s1070_s11 = scalar_lea.hbm %s1069_s24, 16  ;;  %p1075_p2 = scmp.lt.s32.totalorder %s1069_s24, %s1432_s8 }
 0x242   : > { %773 = vst.msk [vmem:[%s1354_s23 + $0x4] sm:$0xf] %vm515_vm5, %v526_v48  ;;  %p1071_p5 = scmp.ne.s32.totalorder %s1069_s24, %s1070_s11  ;;  %p1076_p1 = scmp.lt.s32.totalorder %s1074_s15, %s1070_s11 }
 0x244   : > { %p1072_p7 = pnand %p1071_p5, %p1295_p3  ;;  %p1077_p4 = por %p1076_p1, %p1075_p2 }
 0x246   : > { %p1073_p10 = pneg %p1072_p7 }
 0x248   : > { %p1078_p8 = pnand %p1077_p4, %p1073_p10 }
 0x249   : > { %v546_v49 = vpop.permute.xlu1 %545 }
 0x24a   : > { %777 = vst.msk [vmem:[%s1354_s23 + $0xc] sm:$0xf] %vm515_vm5, %v546_v49 }
 0x24b   : > { %1081 = shalt.err (!%p1078_p8)
}
 0x24c   : > { %807 = dma.vmem_to_hbm [thread:$0]  (%p1295_p3), %s588_s3, 256, %s590_s18, %s556_s21, %s1159_s17, %s1159_s17, %s1160_s12  }
 0x24d PF: > { %s604_s23 = sand.u32 1, %s1128_s27   ;;  %p825_p11 = pnand %p744_p9, %p1255_p6 }
 0x24e   : > { %s605_s5 = scalar_lea.sflag [#allocation4], %s604_s23 }
 0x24f   : > { %p826_p12 = pneg %p825_p11 }
 0x251   : > { %1119 = dma.done.wait (%p826_p12), %s605_s5, 256  }
 0x252   : > { %1121 = vsyncadd (%p826_p12), %s605_s5, 4294967040  ;;  %s615_s20 = scalar_lea.sflag [#allocation12], %s604_s23 }
 0x253   : > { %1123 = dma.done.wait (%p826_p12), %s615_s20, 256  }
 0x254   : > { %1125 = vsyncadd (%p826_p12), %s615_s20, 4294967040  ;;  %s30_s10 = sadd.s32 1, %s1148_s10   ;;  %s1450_s27 = smov %s1132_s28 }
 0x255   : > { %p27_p13 = scmp.ge.s32.totalorder %s30_s10, 4   ;;  %s1451_s28 = smov %s1136_s29 }
 0x256   : > { %s1452_s29 = smov %s1311_s14  ;;  %s1453_s30 = smov %s1144_s9 }
 0x257   : > { %s1454_s9 = smov %s1456_s22  ;;  %29 = sbr.rel (!%p27_p13) target bundleno = 14 (0xe), region = 128 }
 0x25c   :  { %621 = vsyncpa [#allocation3], 1 }
 0x25d   :  { %623 = vsyncpa [#allocation3 + $0x1], 1 }
 0x25e   :  { %624 = vsyncpa [#allocation6], 1 }
 0x25f   :  { %625 = vsyncpa [#allocation9], 1 }
 0x260   :  { %626 = vsyncpa [#allocation4], 1 }
 0x261   :  { %628 = vsyncpa [#allocation4 + $0x1], 1 }
 0x262   :  { %629 = vsyncpa [#allocation12], 1 }
 0x263   :  { %631 = vsyncpa [#allocation12 + $0x1], 1 }

// kernel: tpu_custom_call.1
= control target key start
LH: loop header
LB: loop body
LE: loop exit
PB: predicated region body
PF: predicated region fallthrough
CT: control target
= control target key end

     0   :  { %s1424_s0 = inlined_call_operand.hbm [shape: f32[2,8,32], index: 0, kind: input, shape index: {}]   ;;  %s1425_s1 = inlined_call_operand.hbm [shape: f32[1,32], index: 1, kind: input, shape index: {}]   ;;  %s1426_s2 = inlined_call_operand.vmem [shape: f32[1,32], index: 2, kind: input, shape index: {}]   ;;  %s1427_s3 = inlined_call_operand.hbm [shape: bf16[32,32], index: 3, kind: input, shape index: {}]   ;;  %s1428_s4 = inlined_call_operand.vmem [shape: f32[1,32], index: 4, kind: input, shape index: {}]   ;;  %s1429_s5 = inlined_call_operand.hbm [shape: bf16[32,32], index: 5, kind: input, shape index: {}]   ;;  %s1430_s6 = inlined_call_operand.vmem [shape: f32[1,32], index: 6, kind: input, shape index: {}]   ;;  %s1431_s7 = inlined_call_operand.hbm [shape: bf16[2,4,8,8], index: 7, kind: output, shape index: {0}]   ;;  %s1432_s8 = inlined_call_operand.hbm [shape: bf16[2,4,8,8], index: 8, kind: output, shape index: {1}]  }
   0x1   :  { %1434 = sst [smem:[#allocation19_spill]] %s1425_s1 }
   0x2   :  { %1435 = sst [smem:[#allocation20_spill]] %s1427_s3 }
   0x3   :  { %1436 = sst [smem:[#allocation21_spill]] %s1429_s5 }
   0x4   :  { %14 = vsyncpa [#allocation3], 0 }
   0x5   :  { %16 = vsyncpa [#allocation3 + $0x1], 0 }
   0x6   :  { %17 = vsyncpa [#allocation6], 0 }
   0x7   :  { %18 = vsyncpa [#allocation9], 0 }
   0x8   :  { %19 = vsyncpa [#allocation4], 0 }
   0x9   :  { %21 = vsyncpa [#allocation4 + $0x1], 0 }
   0xa   :  { %22 = vsyncpa [#allocation12], 0 }
   0xb   :  { %24 = vsyncpa [#allocation12 + $0x1], 0  ;;  %s1206_s27 = smov 0   ;;  %s1208_s28 = smov 0  }
   0xc   :  { %s1210_s29 = smov 0   ;;  %s1212_s30 = smov 0  }
   0xd   :  { %s1214_s9 = smov 0   ;;  %s1216_s10 = smov 0  }
   0xe LB: > { %s738_s11 = sadd.s32 4294967295, %s1148_s10   ;;  %s739_s12 = sadd.s32 4294967294, %s1148_s10   ;;  %s1148_s10 = sphi %s1216_s10, %s30_s10   ;;  %s1144_s9 = sphi %s1214_s9, %s1454_s9   ;;  %s1140_s30 = sphi %s1212_s30, %s1453_s30   ;;  %s1136_s29 = sphi %s1210_s29, %s1452_s29   ;;  %s1132_s28 = sphi %s1208_s28, %s1451_s28   ;;  %s1128_s27 = sphi %s1206_s27, %s1450_s27  }
   0xf   : > { %p64_p0 = scmp.ne.s32.totalorder %s1132_s28, %s1128_s27  ;;  %p1240_p1 = scmp.eq.s32.totalorder %s738_s11, 0 }
  0x10   : > { %p1244_p2 = scmp.eq.s32.totalorder %s738_s11, 1  ;;  %p222_p3 = scmp.eq.s32.totalorder %s739_s12, 1 }
  0x11   : > { %p1250_p4 = por %p1240_p1, %p64_p0  ;;  %p740_p5 = scmp.ge.s32.totalorder %s1148_s10, 1 }
  0x12   : > { %p1255_p6 = por %p222_p3, %p64_p0  ;;  %p257_p7 = scmp.lt.s32.totalorder %s1148_s10, 3 }
  0x13   : > { %s1442_s1 = sld [smem:[#allocation19_spill]]  ;;  %p744_p9 = scmp.ge.s32.totalorder %s1148_s10, 2 }
  0x14   : > { %s1440_s16 = scalar_select %p1255_p6, 1, 0 }
  0x15   : > { %p1263_p8 = pnand %p740_p5, %p257_p7  ;;  %s1150_s21 = smov [#allocation5]  }
  0x16   : > { %1441 = sst [smem:[#allocation18_spill]] %s1440_s16  ;;  %s271_s22 = sshll.u32 %s1150_s21, 4  ;;  %s272_s22 = int_to_ptr.vmem [resolvable:$true] %s271_s22 }
  0x17   : > { %p810_p10 = pneg %p1263_p8  ;;  %s1444_s3 = sld [smem:[#allocation20_spill]] }
  0x18   : > { %s1151_s11 = smov [#allocation7]   ;;  %s1152_s17 = smov 64  }
  0x19   : > { %s269_s19 = sshll.u32 %s1442_s1, 4  ;;  %p1275_p11 = pnand %p810_p10, %p1240_p1  ;;  %s270_s19 = int_to_ptr.hbm [resolvable:$true] %s269_s19 }
  0x1a   : > { %s285_s12 = sshll.u32 %s1151_s11, 4  ;;  %s1153_s18 = smov 4   ;;  %s286_s12 = int_to_ptr.vmem [resolvable:$true] %s285_s12 }
  0x1b   : > { %813 = dma.hbm_to_vmem [thread:$0]  (!%p1275_p11), %s270_s19, 16, %s272_s22, [#allocation6]  }
  0x1c   : > { %s1446_s5 = sld [smem:[#allocation21_spill]]  ;;  %s1154_s1 = smov [#allocation8]  }
  0x1d   : > { %s283_s25 = sshll.u32 %s1444_s3, 4  ;;  %s302_s3 = sshll.u32 %s1154_s1, 4  ;;  %s284_s25 = int_to_ptr.hbm [resolvable:$true] %s283_s25  ;;  %s303_s3 = int_to_ptr.vmem [resolvable:$true] %s302_s3 }
  0x1e   : > { %816 = dma.hbm_to_vmem [thread:$0]  (!%p1275_p11), %s284_s25, 256, %s286_s12, [#allocation6], %s1152_s17, %s1152_s17, %s1153_s18  }
  0x1f   : > { %s51_s19 = sadd.s32 1, %s1136_s29  ;;  %s42_s22 = sadd.s32 1, %s1144_s9 }
  0x20   : > { %p58_p12 = scmp.ne.s32.totalorder %s1136_s29, %s1132_s28  ;;  %p44_p13 = scmp.ge.s32.totalorder %s42_s22, 2 }
  0x21   : > { %p59_p0 = scmp.eq.s32.totalorder %s1148_s10, 0  ;;  %p834_p5 = scmp.lt.s32.totalorder %s1148_s10, 2 }
  0x22   : > { %s300_s24 = sshll.u32 %s1446_s5, 4  ;;  %p1295_p3 = por %p1244_p2, %p58_p12  ;;  %s301_s24 = int_to_ptr.hbm [resolvable:$true] %s300_s24 }
  0x23   : > { %819 = dma.hbm_to_vmem [thread:$0]  (!%p1275_p11), %s301_s24, 256, %s303_s3, [#allocation9], %s1152_s17, %s1152_s17, %s1153_s18  }
  0x24   : > { %s1456_s22 = smov (%p44_p13, %s42_s22), 0  ;;  %p1302_p7 = por %p59_p0, %p58_p12 }
  0x25   : > { %s319_s3 = sand.u32 1, %s1136_s29   ;;  %s46_s26 = ssub.s32 %s1144_s9, %s1456_s22 }
  0x26   : > { %p49_p10 = scmp.eq.s32.totalorder %s46_s26, 0  ;;  %s745_s11 = sshll.u32 %s319_s3, 3 }
  0x27   : > { %s746_s12 = sshll.u32 %s1144_s9, 3  ;;  %s323_s23 = scalar_lea.vmem [#allocation2], %s745_s11 }
  0x28   : > { %s1311_s14 = scalar_select %p49_p10, %s1136_s29, %s51_s19  }
  0x29   : > { %s328_s21 = scalar_lea.hbm %s1424_s0, %s746_s12  ;;  %s332_s24 = sshll.u32 %s323_s23, 4  ;;  %s333_s24 = int_to_ptr.vmem [resolvable:$true] %s332_s24 }
  0x2a   : > { %s330_s5 = sshll.u32 %s328_s21, 4  ;;  %p821_p2 = pnand %p834_p5, %p1302_p7  ;;  %s331_s5 = int_to_ptr.hbm [resolvable:$true] %s330_s5 }
  0x2b   : > { %s320_s16 = scalar_lea.sflag [#allocation3], %s319_s3  ;;  %341 = sbr.rel (%p1263_p8) target bundleno = 589 (0x24d), region = 48 }
  0x2c   : > { %823 = dma.hbm_to_vmem [thread:$0]  (!%p821_p2), %s331_s5, 128, %s333_s24, %s320_s16  }
  0x2d   : > { %s1323_s19 = sand.u32 (!%p1263_p8), 1, %s1132_s28  }
  0x2e   : > { %s748_s26 = sshll.u32 (!%p1263_p8), %s1323_s19, 3  ;;  %s344_s11 = scalar_lea.sflag (!%p1263_p8), [#allocation3], %s1323_s19 }
  0x2f   : > { %s347_s12 = scalar_lea.vmem (!%p1263_p8), [#allocation2], %s748_s26 }
  0x30   : > { %1107 = dma.done.wait (%p1250_p4), %s344_s11, 128  }
  0x31   : > { %1109 = vsyncadd (%p1250_p4), %s344_s11, 4294967168 }
  0x32   : > { %1111 = dma.done.wait (%p1240_p1), [#allocation6], 272  }
  0x33   : > { %1113 = vsyncadd (%p1240_p1), [#allocation6], 4294967024 }
  0x34   : > { %1115 = dma.done.wait (%p1240_p1), [#allocation9], 256  }
  0x35   : > { %1117 = vsyncadd (%p1240_p1), [#allocation9], 4294967040  ;;  %vm405_vm0 = vcmask 261120   ;;  %v402_v0 = vld [vmem:[%s347_s12] sm:$0xff]  ;;  %v1155_v2 = vmov 32.0   ;;  %v786_v16 = vld [vmem:[#allocation7] sm:$0xff] }
  0x36   : > { %v406_v1 = vsel %vm405_vm0, %v402_v0, 0.0  ;;  %902 = vrcp.f32 %v1155_v2  ;;  %v787_v14 = vld [vmem:[#allocation7 + $0x8] sm:$0xff]  ;;  %v789_v15 = vld [vmem:[#allocation8 + $0x8] sm:$0xff]  ;;  %v788_v17 = vld [vmem:[#allocation8] sm:$0xff]  ;;  %s752_s3 = sshll.u32 %s1323_s19, 4  ;;  %vm515_vm5 = vcmask 60416  }
  0x37   : > { %407 = vadd.xlane.f32.xlu0 %v406_v1  ;;  %473 = vmatpush.bf16.msra.mxu0 %v787_v14  ;;  %v898_v27 = vld [vmem:[#allocation5] ss:$0 sm:$0xff]  ;;  %v899_v30 = vld [vmem:[%s1426_s2] ss:$0 sm:$0xff]  ;;  %s393_s17 = scalar_lea.vmem [#allocation10], %s752_s3  ;;  %s1156_s18 = smov 104  }
  0x38   : > { %506 = vmatpush.bf16.msra.mxu1 %v789_v15  ;;  %v900_v34 = vld [vmem:[%s1428_s4] ss:$0 sm:$0xff]  ;;  %s1157_s21 = smov 112   ;;  %s1354_s23 = scalar_lea.vmem [#allocation11], %s752_s3 }
  0x39   : > { %v901_v35 = vld [vmem:[%s1430_s6] ss:$0 sm:$0xff]  ;;  %s1158_s24 = smov 120   ;;  %s790_s26 = sshll.u32 %s1140_s30, 4 }
  0x3a   : > { %s568_s5 = scalar_lea.hbm %s1431_s7, %s790_s26  ;;  %s569_s13 = sshll.u32 %s393_s17, 4  ;;  %s570_s13 = int_to_ptr.vmem [resolvable:$true] %s569_s13 }
  0x3b   : > { %474 = vmatpush.bf16.msra.mxu0 %v786_v16  ;;  %s571_s15 = sshll.u32 %s568_s5, 4  ;;  %s551_s16 = scalar_lea.sflag [#allocation4], %s1323_s19  ;;  %s572_s15 = int_to_ptr.hbm [resolvable:$true] %s571_s15 }
  0x3c   : > { %v903_v3 = vpop.eup %902  ;;  %507 = vmatpush.bf16.msra.mxu1 %v788_v17  ;;  %s1040_s20 = sshra.s32 %s572_s15, 4  ;;  %s1041_s20 = int_to_ptr.hbm [resolvable:$true] %s1040_s20 }
  0x3d   : > { %v410_v4 = vmul.f32 32.0, %v903_v3  ;;  %vm414_vm1 = vweird.f32 %v903_v3  ;;  %s1042_s1 = scalar_lea.hbm %s1041_s20, 16  ;;  %p1047_p11 = scmp.lt.s32.totalorder %s1041_s20, %s1431_s7 }
  0x3e   : > { %p1043_p1 = scmp.ne.s32.totalorder %s1041_s20, %s1042_s1 }
  0x3f   : > { %v411_v5 = vsub.f32 1.0, %v410_v4 }
  0x40   : > { %p1044_p4 = pnand %p1043_p1, %p1295_p3 }
  0x41   : > { %v412_v6 = vmul.f32 %v903_v3, %v411_v5 }
  0x42   : > { %p1045_p8 = pneg %p1044_p4 }
  0x43   : > { %v413_v7 = vadd.f32 %v903_v3, %v412_v6 }
  0x45   : > { %v415_v8 = vsel %vm414_vm1, %v903_v3, %v413_v7 }
  0xaa   : > { %v408_v9 = vpop.xlane.xlu0 %407 }
  0xab   : > { %v416_v10 = vmul.f32 %v415_v8, %v408_v9 }
  0xad   : > { %v417_v11 = vsub.f32 %v402_v0, %v416_v10 }
  0xaf   : > { %v418_v12 = vmul.f32 %v417_v11, %v417_v11 }
  0xb1   : > { %v419_v13 = vsel %vm405_vm0, %v418_v12, 0.0 }
  0xb2   : > { %420 = vadd.xlane.f32.xlu0 %v419_v13 }
 0x125   : > { %v421_v18 = vpop.xlane.xlu0 %420 }
 0x126   : > { %v422_v19 = vmul.f32 %v421_v18, %v415_v8 }
 0x128   : > { %v423_v20 = vadd.f32 1e-05, %v422_v19 }
 0x12a   : > { %904 = vrsqrt.f32 %v423_v20  ;;  %vm430_vm3 = vweird.f32 %v423_v20 }
 0x130   : > { %v905_v21 = vpop.eup %904 }
 0x131   : > { %v425_v22 = vmul.f32 %v905_v21, %v423_v20  ;;  %vm431_vm2 = vweird.f32 %v905_v21 }
 0x132   : > { %vm432_vm4 = vmor %vm430_vm3, %vm431_vm2 }
 0x133   : > { %v426_v23 = vmul.f32 %v905_v21, %v425_v22 }
 0x135   : > { %v427_v24 = vmul.f32 0.5, %v426_v23 }
 0x137   : > { %v428_v25 = vsub.f32 1.5, %v427_v24 }
 0x139   : > { %v429_v26 = vmul.f32 %v905_v21, %v428_v25 }
 0x13b   : > { %v433_v28 = vsel %vm432_vm4, %v905_v21, %v429_v26 }
 0x13c   : > { %v434_v29 = vmul.f32 %v433_v28, %v417_v11 }
 0x13e   : > { %v438_v31 = vmul.f32 %v898_v27, %v434_v29 }
 0x140   : > { %v442_v32 = vadd.f32 %v899_v30, %v438_v31 }
 0x142   : > { %v443_v33 = vpack.c.bf16 %v442_v32, %v442_v32 }
 0x144   : > { %762 = vmatmul.msk.bf16.vlgmr.msra.gmra.mxu0 %vm405_vm0, %v443_v33  ;;  %771 = vmatmul.msk.bf16.vlgmr.msra.gmra.mxu1 %vm405_vm0, %v443_v33 }
 0x1c1   : > { %v476_v36 = vpop.f32.mrf.mxu0  ;;  %v509_v37 = vpop.f32.mrf.mxu1 }
 0x1c2   : > { %v477_v38 = vadd.f32 %v900_v34, %v476_v36  ;;  %v510_v39 = vadd.f32 %v901_v35, %v509_v37 }
 0x1c4   : > { %v513_v40 = vpack.c.bf16 %v477_v38, %v477_v38  ;;  %v514_v41 = vpack.c.bf16 %v510_v39, %v510_v39 }
 0x1c6   : > { %516 = vst.msk [vmem:[%s393_s17] sm:$0xf] %vm515_vm5, %v513_v40  ;;  %540 = vrot.lane.b32.xlu0 %v513_v40, %s1156_s18  ;;  %530 = vrot.lane.b32.xlu2 %v513_v40, %s1157_s21 }
 0x1c7   : > { %517 = vst.msk [vmem:[%s1354_s23] sm:$0xf] %vm515_vm5, %v514_v41  ;;  %519 = vrot.lane.b32.xlu1 %v513_v40, %s1158_s24 }
 0x1c9   : > { %v478_v42 = vpop.f32.mrf.mxu0  ;;  %v511_v43 = vpop.f32.mrf.mxu1 }
 0x1ce   : > { %535 = vrot.lane.b32.xlu2 %v514_v41, %s1157_s21  ;;  %s1046_s21 = scalar_lea.hbm %s1431_s7, 32 }
 0x1cf   : > { %525 = vrot.lane.b32.xlu1 %v514_v41, %s1158_s24  ;;  %p1048_p12 = scmp.lt.s32.totalorder %s1046_s21, %s1042_s1 }
 0x1d1   : > { %p1049_p13 = por %p1048_p12, %p1047_p11 }
 0x1d3   : > { %p1050_p0 = pnand %p1049_p13, %p1045_p8 }
 0x1d7   : > { %545 = vrot.lane.b32.xlu1 %v514_v41, %s1156_s18 }
 0x220   : > { %v531_v44 = vpop.permute.xlu2 %530 }
 0x221   : > { %774 = vst.msk [vmem:[%s393_s17 + $0x8] sm:$0xf] %vm515_vm5, %v531_v44 }
 0x228   : > { %v536_v45 = vpop.permute.xlu2 %535 }
 0x229   : > { %775 = vst.msk [vmem:[%s1354_s23 + $0x8] sm:$0xf] %vm515_vm5, %v536_v45 }
 0x238   : > { %v541_v46 = vpop.permute.xlu0 %540 }
 0x239   : > { %776 = vst.msk [vmem:[%s393_s17 + $0xc] sm:$0xf] %vm515_vm5, %v541_v46  ;;  %v520_v47 = vpop.permute.xlu1 %519 }
 0x23a   : > { %772 = vst.msk [vmem:[%s393_s17 + $0x4] sm:$0xf] %vm515_vm5, %v520_v47 }
 0x23b   : > { %1053 = shalt.err (!%p1050_p0)
}
 0x23c   : > { %s1159_s17 = smov 64   ;;  %s1160_s12 = smov 4  }
 0x23d   : > { %806 = dma.vmem_to_hbm [thread:$0]  (%p1295_p3), %s570_s13, 256, %s572_s15, %s551_s16, %s1159_s17, %s1159_s17, %s1160_s12  }
 0x23e   : > { %s586_s1 = scalar_lea.hbm %s1432_s8, %s790_s26  ;;  %s587_s3 = sshll.u32 %s1354_s23, 4  ;;  %s588_s3 = int_to_ptr.vmem [resolvable:$true] %s587_s3 }
 0x23f   : > { %s589_s18 = sshll.u32 %s586_s1, 4  ;;  %s556_s21 = scalar_lea.sflag [#allocation12], %s1323_s19  ;;  %s590_s18 = int_to_ptr.hbm [resolvable:$true] %s589_s18 }
 0x240   : > { %s1068_s24 = sshra.s32 %s590_s18, 4  ;;  %s1074_s15 = scalar_lea.hbm %s1432_s8, 32  ;;  %s1069_s24 = int_to_ptr.hbm [resolvable:$true] %s1068_s24 }
 0x241   : > { %v526_v48 = vpop.permute.xlu1 %525  ;;  %s1070_s11 = scalar_lea.hbm %s1069_s24, 16  ;;  %p1075_p2 = scmp.lt.s32.totalorder %s1069_s24, %s1432_s8 }
 0x242   : > { %773 = vst.msk [vmem:[%s1354_s23 + $0x4] sm:$0xf] %vm515_vm5, %v526_v48  ;;  %p1071_p5 = scmp.ne.s32.totalorder %s1069_s24, %s1070_s11  ;;  %p1076_p1 = scmp.lt.s32.totalorder %s1074_s15, %s1070_s11 }
 0x244   : > { %p1072_p7 = pnand %p1071_p5, %p1295_p3  ;;  %p1077_p4 = por %p1076_p1, %p1075_p2 }
 0x246   : > { %p1073_p10 = pneg %p1072_p7 }
 0x248   : > { %p1078_p8 = pnand %p1077_p4, %p1073_p10 }
 0x249   : > { %v546_v49 = vpop.permute.xlu1 %545 }
 0x24a   : > { %777 = vst.msk [vmem:[%s1354_s23 + $0xc] sm:$0xf] %vm515_vm5, %v546_v49 }
 0x24b   : > { %1081 = shalt.err (!%p1078_p8)
}
 0x24c   : > { %807 = dma.vmem_to_hbm [thread:$0]  (%p1295_p3), %s588_s3, 256, %s590_s18, %s556_s21, %s1159_s17, %s1159_s17, %s1160_s12  }
 0x24d PF: > { %s604_s23 = sand.u32 1, %s1128_s27   ;;  %p825_p11 = pnand %p744_p9, %p1255_p6 }
 0x24e   : > { %s605_s5 = scalar_lea.sflag [#allocation4], %s604_s23 }
 0x24f   : > { %p826_p12 = pneg %p825_p11 }
 0x251   : > { %1119 = dma.done.wait (%p826_p12), %s605_s5, 256  }
 0x252   : > { %1121 = vsyncadd (%p826_p12), %s605_s5, 4294967040  ;;  %s615_s20 = scalar_lea.sflag [#allocation12], %s604_s23 }
 0x253   : > { %1123 = dma.done.wait (%p826_p12), %s615_s20, 256  }
 0x254   : > { %1125 = vsyncadd (%p826_p12), %s615_s20, 4294967040  ;;  %s30_s10 = sadd.s32 1, %s1148_s10   ;;  %s1450_s27 = smov %s1132_s28 }
 0x255   : > { %p27_p13 = scmp.ge.s32.totalorder %s30_s10, 4   ;;  %s1451_s28 = smov %s1136_s29 }
 0x256   : > { %s1452_s29 = smov %s1311_s14  ;;  %s1453_s30 = smov %s1144_s9 }
 0x257   : > { %s1454_s9 = smov %s1456_s22  ;;  %29 = sbr.rel (!%p27_p13) target bundleno = 14 (0xe), region = 128 }
 0x25c   :  { %621 = vsyncpa [#allocation3], 1 }
 0x25d   :  { %623 = vsyncpa [#allocation3 + $0x1], 1 }
 0x25e   :  { %624 = vsyncpa [#allocation6], 1 }
 0x25f   :  { %625 = vsyncpa [#allocation9], 1 }
 0x260   :  { %626 = vsyncpa [#allocation4], 1 }
 0x261   :  { %628 = vsyncpa [#allocation4 + $0x1], 1 }
 0x262   :  { %629 = vsyncpa [#allocation12], 1 }
 0x263   :  { %631 = vsyncpa [#allocation12 + $0x1], 1 }

</bundles_post_ra>
